<compile_context>
chip_gen: v6e
topology: v6e:2x2x1
jax: 0.10.0
libtpu: 0.0.40
codegen_flags: <defaults>
</compile_context>

<pallas_src>
import functools
from typing import List, Optional, Tuple

import jax
import jax.numpy as jnp
from jax.experimental import pallas as pl
from jax.experimental.pallas import tpu as pltpu


LANE = 128
STATE_ROWS = 3                      # rows: n_obs, sum_reward, sum_reward^2
ROW_N_OBS, ROW_SUM_R, ROW_SUM_R2 = 0, 1, 2


def _pad_arms(n_arms: int) -> int:
    return max(LANE, ((n_arms + LANE - 1) // LANE) * LANE)


def _maybe_compiler_params(n_pad: int):
    # Single-block design: roughly (state in + batch in + out + slack) f32
    # operands resident in VMEM with no pipelining.  Bump the scoped-VMEM
    # limit when the packed state gets big (default scoped limits: 16 MiB
    # v5e, 32 MiB v6e/v7x).  For extreme arm counts (hundreds of thousands of
    # padded lanes) a lane-axis grid would be required instead, especially on
    # v7x (64 MiB physical VMEM per TensorCore).
    need = 4 * STATE_ROWS * n_pad * 4
    if need > (12 << 20):
        return pltpu.CompilerParams(vmem_limit_bytes=min(2 * need, 100 << 20))
    return None


# ----------------------------------------------------------------------------
# Pallas kernels
# ----------------------------------------------------------------------------
def _update_kernel(state_ref, batch_ref, out_state_ref, inc_ref):
    """Fused state accumulate + observation-count increment.

    state_ref / out_state_ref : (3, n_pad) f32 VMEM (aliased -> in-place add)
    batch_ref                 : (3, n_pad) f32 VMEM (zero-padded batch rows)
    inc_ref                   : (1, 1)    f32 VMEM (sum of the n_obs row)
    """
    b = batch_ref[...]
    out_state_ref[...] = state_ref[...] + b
    # Padding lanes of the batch are zero, so this equals sum over real arms.
    inc_ref[...] = jnp.sum(b[ROW_N_OBS:ROW_N_OBS + 1, :], axis=-1, keepdims=True)


# ----------------------------------------------------------------------------
# Fused (single-dispatch) device paths
# ----------------------------------------------------------------------------
@functools.partial(jax.jit, donate_argnums=(0, 1))
def _update_state(state, count, n_obs, sum_r, sum_r2):
    """Pad the batch vectors into the packed (3, n_pad) layout, accumulate in
    place, and bump the device-side int32 observation count — one dispatch."""
    rows, n_pad = state.shape
    n = n_obs.shape[0]
    pad = n_pad - n

    batch = jnp.stack(
        [
            jnp.pad(n_obs.astype(jnp.float32), (0, pad)),
            jnp.pad(sum_r.astype(jnp.float32), (0, pad)),
            jnp.pad(sum_r2.astype(jnp.float32), (0, pad)),
        ],
        axis=0,
    )  # (3, n_pad)

    vspec = pl.BlockSpec((rows, n_pad), lambda: (0, 0))
    new_state, inc = pl.pallas_call(
        _update_kernel,
        out_shape=(
            jax.ShapeDtypeStruct((rows, n_pad), jnp.float32),
            jax.ShapeDtypeStruct((1, 1), jnp.float32),
        ),
        in_specs=[vspec, vspec],
        out_specs=(vspec, pl.BlockSpec((1, 1), lambda: (0, 0))),
        input_output_aliases={0: 0},          # accumulate into the state buffer
        compiler_params=_maybe_compiler_params(n_pad),
    )(state, batch)

    # int32 truncation toward zero matches torch's int(n_obs.sum().item()).
    # TODO(synk): int32 running count overflows past ~2.1e9 total observations
    # (the torch reference uses an unbounded Python int).
    new_count = count + inc[0, 0].astype(jnp.int32)
    return new_state, new_count


@functools.partial(jax.jit, static_argnums=(1,))
def _avg_and_argmax(state, n_arms):
    """Fused avg-reward row + argmax over the valid (first n_arms) lanes."""
    rows, n_pad = state.shape

    def kernel(state_ref, avg_ref, best_ref):
        n_row = state_ref[ROW_N_OBS:ROW_N_OBS + 1, :]
        sr_row = state_ref[ROW_SUM_R:ROW_SUM_R + 1, :]
        # Plain division: matches torch semantics (0/0 -> NaN, x/0 -> inf).
        avg = sr_row / n_row
        avg_ref[...] = avg

        lane = jax.lax.broadcasted_iota(jnp.int32, (1, n_pad), 1)
        valid = lane < n_arms
        key = jnp.where(valid, avg, -jnp.inf)
        # torch.argmax treats NaN as maximal; emulate by mapping NaN -> +inf.
        key = jnp.where(valid & jnp.isnan(avg), jnp.inf, key)
        m = jnp.max(key, axis=-1, keepdims=True)
        cand = jnp.where(key == m, lane, jnp.int32(n_pad))   # first max index
        best_ref[...] = jnp.min(cand, axis=-1, keepdims=True)

    avg_full, best = pl.pallas_call(
        kernel,
        out_shape=(
            jax.ShapeDtypeStruct((1, n_pad), jnp.float32),
            jax.ShapeDtypeStruct((1, 1), jnp.int32),
        ),
        in_specs=[pl.BlockSpec((rows, n_pad), lambda: (0, 0))],
        out_specs=(
            pl.BlockSpec((1, n_pad), lambda: (0, 0)),
            pl.BlockSpec((1, 1), lambda: (0, 0)),
        ),
        compiler_params=_maybe_compiler_params(n_pad),
    )(state)
    return avg_full[0, :n_arms], best[0, 0]


# ----------------------------------------------------------------------------
# Host-side glue (string-id reindexing) — identical semantics to the PyTorch
# helpers, operating on jnp arrays.
# ----------------------------------------------------------------------------
def get_arm_indices(ids_of_all_arms: List[str], ids_of_arms_in_batch: List[str]) -> List[int]:
    arm_idxs = []
    for i in ids_of_arms_in_batch:
        try:
            arm_idxs.append(ids_of_all_arms.index(i))
        except ValueError:
            raise ValueError(f"Unknown arm_id {i}. Known arm ids: {ids_of_all_arms}")
    return arm_idxs


def place_values_at_indices(values: jnp.ndarray, idxs: List[int], total_len: int) -> jnp.ndarray:
    values = jnp.asarray(values, dtype=jnp.float32)
    assert values.shape[0] == len(idxs)
    ret = jnp.zeros((total_len,), dtype=jnp.float32)
    return ret.at[jnp.asarray(idxs, dtype=jnp.int32)].set(values)


def reindex_multiple_tensors(
    all_ids: List[str],
    batch_ids: Optional[List[str]],
    value_tensors: Tuple[jnp.ndarray, ...],
) -> Tuple[jnp.ndarray, ...]:
    if batch_ids is None or batch_ids == all_ids:
        return value_tensors
    assert len(batch_ids) == len(set(batch_ids))
    arm_idxs = get_arm_indices(all_ids, batch_ids)
    return tuple(place_values_at_indices(v, arm_idxs, len(all_ids)) for v in value_tensors)


# ----------------------------------------------------------------------------
# MABAlgo (Pallas-backed)
# ----------------------------------------------------------------------------
class MABAlgoPallas:
    def __init__(self, *, n_arms: Optional[int] = None, arm_ids: Optional[List[str]] = None):
        if n_arms is not None:
            self.arm_ids = list(map(str, range(n_arms)))
            self.n_arms = n_arms
        if arm_ids is not None:
            self.arm_ids = list(arm_ids)
            self.n_arms = len(arm_ids)
        # Cached arm_id -> index map (avoids O(n) list.index per lookup).
        self._arm_idx = {a: i for i, a in enumerate(self.arm_ids)}
        self._n_pad = _pad_arms(self.n_arms)
        # Packed per-arm statistics; rows 0..2 = n_obs, sum_reward, sum_reward^2.
        self._state = jnp.zeros((STATE_ROWS, self._n_pad), jnp.float32)
        # Device-side running observation count (int32 scalar).
        self._total_n_obs_all_arms = jnp.zeros((), jnp.int32)

    # ---- read-only views onto the packed state ---------------------------
    @property
    def total_n_obs_per_arm(self) -> jnp.ndarray:
        return self._state[ROW_N_OBS, : self.n_arms]

    @property
    def total_sum_reward_per_arm(self) -> jnp.ndarray:
        return self._state[ROW_SUM_R, : self.n_arms]

    @property
    def total_sum_reward_squared_per_arm(self) -> jnp.ndarray:
        return self._state[ROW_SUM_R2, : self.n_arms]

    @property
    def total_n_obs_all_arms(self) -> int:
        # Device -> host pull happens only when the count is actually read.
        return int(self._total_n_obs_all_arms)

    # ---- reindexing (host glue, cached dict lookup) -----------------------
    def _reindex(self, batch_ids, tensors):
        if batch_ids is None or batch_ids == self.arm_ids:
            return tensors
        assert len(batch_ids) == len(set(batch_ids))
        try:
            idxs = [self._arm_idx[i] for i in batch_ids]
        except KeyError as e:
            raise ValueError(f"Unknown arm_id {e.args[0]}. Known arm ids: {self.arm_ids}")
        return tuple(place_values_at_indices(v, idxs, self.n_arms) for v in tensors)

    # ---- updates ----------------------------------------------------------
    def add_batch_observations(
        self,
        n_obs_per_arm: jnp.ndarray,
        sum_reward_per_arm: jnp.ndarray,
        sum_reward_squared_per_arm: jnp.ndarray,
        arm_ids: Optional[List[str]] = None,
    ):
        n_obs_per_arm, sum_reward_per_arm, sum_reward_squared_per_arm = self._reindex(
            arm_ids, (n_obs_per_arm, sum_reward_per_arm, sum_reward_squared_per_arm)
        )
        self._state, self._total_n_obs_all_arms = _update_state(
            self._state,
            self._total_n_obs_all_arms,
            jnp.asarray(n_obs_per_arm),
            jnp.asarray(sum_reward_per_arm),
            jnp.asarray(sum_reward_squared_per_arm),
        )

    def add_single_observation(self, arm_id: str, reward: float):
        assert arm_id in self._arm_idx
        arm_idx = self._arm_idx[arm_id]
        self.add_batch_observations(
            place_values_at_indices(jnp.asarray([1.0]), [arm_idx], self.n_arms),
            place_values_at_indices(jnp.asarray([reward]), [arm_idx], self.n_arms),
            place_values_at_indices(jnp.asarray([reward ** 2]), [arm_idx], self.n_arms),
        )

    # ---- scoring ----------------------------------------------------------
    def get_avg_reward_values(self) -> jnp.ndarray:
        avg, _ = _avg_and_argmax(self._state, self.n_arms)
        return avg

    # TODO(synk): MABAlgo.forward is abstract in the reference module; the shared
    # per-arm statistics pipeline is what we kernelize, and get_avg_reward_values()
    # (the only concrete scoring helper) is exposed as the forward.
    def forward(self) -> jnp.ndarray:
        return self.get_avg_reward_values()

    def __call__(self) -> jnp.ndarray:
        return self.forward()

    def get_action(self) -> str:
        # Argmax is fused into the scoring kernel: only one scalar is pulled.
        _, best = _avg_and_argmax(self._state, self.n_arms)
        return self.arm_ids[int(best)]

    def reset(self):
        self.__init__(arm_ids=self.arm_ids)

    @classmethod
    def get_scores_from_batch(cls, n_obs_per_arm, sum_reward_per_arm, sum_reward_squared_per_arm):
        n_arms = int(n_obs_per_arm.shape[0])
        b = cls(n_arms=n_arms)
        b.add_batch_observations(n_obs_per_arm, sum_reward_per_arm, sum_reward_squared_per_arm)
        return b()

    def __repr__(self):
        t = ", ".join(
            f"{float(v):.3f} ({int(n)})"
            for v, n in zip(self.get_avg_reward_values(), self.total_n_obs_per_arm)
        )
        return f"{type(self).__name__}({self.n_arms} arms; {t}"


if __name__ == "__main__":
    key = jax.random.PRNGKey(0)
    n_arms = 8
    k1, k2 = jax.random.split(key)

    # deterministic synthetic batch observations
    n_obs_per_arm = jnp.floor(jax.random.uniform(k1, (n_arms,), minval=1.0, maxval=10.0))
    rewards_mean = jax.random.uniform(k2, (n_arms,), minval=0.0, maxval=1.0)
    sum_reward_per_arm = n_obs_per_arm * rewards_mean
    sum_reward_squared_per_arm = n_obs_per_arm * (rewards_mean ** 2 + 0.01)

    bandit = MABAlgoPallas(n_arms=n_arms)
    bandit.add_batch_observations(n_obs_per_arm, sum_reward_per_arm, sum_reward_squared_per_arm)

    # second batch with reindexing by arm ids (exercise host-side glue)
    bandit.add_batch_observations(
        jnp.asarray([2.0, 3.0]),
        jnp.asarray([1.5, 0.5]),
        jnp.asarray([1.2, 0.3]),
        arm_ids=["3", "0"],
    )

    scores = bandit()  # avg reward per arm, computed in the fused Pallas kernel
    scores = jax.block_until_ready(scores)

    # reference check in plain JAX
    ref_n = n_obs_per_arm.at[3].add(2.0).at[0].add(3.0)
    ref_sr = sum_reward_per_arm.at[3].add(1.5).at[0].add(0.5)
    ref = ref_sr / ref_n
    assert scores.shape == (n_arms,)
    assert jnp.allclose(scores, ref, rtol=1e-6, atol=1e-6)
    # running count was kept on device; this is the only host pull of it
    assert bandit.total_n_obs_all_arms == int(jnp.sum(n_obs_per_arm)) + 5

    # exercise the single-observation path and the fused argmax action path
    bandit.add_single_observation("2", 0.7)
    assert float(bandit.total_n_obs_per_arm[2]) == float(ref_n[2]) + 1.0
    action = bandit.get_action()
    expected_action = bandit.arm_ids[int(jnp.argmax(bandit.get_avg_reward_values()))]
    assert action == expected_action

    print("KERNEL_OK")
</pallas_src>

<mosaic_0001>
module attributes {stable_mosaic.version = 11 : i64} {
  func.func @_update_kernel(%arg0: memref<3x128xf32, #tpu.memory_space<vmem>>, %arg1: memref<3x128xf32, #tpu.memory_space<vmem>>, %arg2: memref<3x128xf32, #tpu.memory_space<vmem>>, %arg3: memref<1x1xf32, #tpu.memory_space<vmem>>) attributes {dimension_semantics = [], scalar_prefetch = 0 : i64, scratch_operands = 0 : i64, tpu.core_type = #tpu.core_type<tc>} {
    %c0 = arith.constant 0 : index
    %c0_0 = arith.constant 0 : index
    %0 = vector.load %arg1[%c0, %c0_0] : memref<3x128xf32, #tpu.memory_space<vmem>>, vector<3x128xf32>
    %c0_1 = arith.constant 0 : index
    %c0_2 = arith.constant 0 : index
    %1 = vector.load %arg0[%c0_1, %c0_2] : memref<3x128xf32, #tpu.memory_space<vmem>>, vector<3x128xf32>
    %2 = arith.addf %1, %0 : vector<3x128xf32>
    %c0_3 = arith.constant 0 : index
    %c0_4 = arith.constant 0 : index
    %3 = vector.load %arg2[%c0_3, %c0_4] : memref<3x128xf32, #tpu.memory_space<vmem>>, vector<3x128xf32>
    tpu.vector_store %arg2[%c0_3, %c0_4], %2 {strides = array<i32>} : memref<3x128xf32, #tpu.memory_space<vmem>>, vector<3x128xf32>,
    %4 = vector.extract_strided_slice %0 {offsets = [0, 0], sizes = [1, 128], strides = [1, 1]} : vector<3x128xf32> to vector<1x128xf32>
    %cst = arith.constant dense<0.000000e+00> : vector<1xf32>
    %5 = vector.multi_reduction <add>, %4, %cst [1] : vector<1x128xf32> to vector<1xf32>
    %6 = vector.shape_cast %5 : vector<1xf32> to vector<1x1xf32>
    %c0_5 = arith.constant 0 : index
    %c0_6 = arith.constant 0 : index
    %7 = vector.load %arg3[%c0_5, %c0_6] : memref<1x1xf32, #tpu.memory_space<vmem>>, vector<1x1xf32>
    tpu.vector_store %arg3[%c0_5, %c0_6], %6 {strides = array<i32>} : memref<1x1xf32, #tpu.memory_space<vmem>>, vector<1x1xf32>,
    return
  }
}

</mosaic_0001>

<bundles_post_ra>
// kernel: _update_state.1
= control target key start
LH: loop header
LB: loop body
LE: loop exit
PB: predicated region body
PF: predicated region fallthrough
CT: control target
= control target key end

     0   :  { %vm18_vm0 = vcmask 1040384   ;;  %s98_s0 = inlined_call_operand.vmem [shape: f32[3,128], index: 0, kind: input, shape index: {}, may-alias: {0,2}]   ;;  %s99_s1 = inlined_call_operand.vmem [shape: f32[3,128], index: 1, kind: input, shape index: {}]   ;;  %s100_s2 = inlined_call_operand.vmem [shape: f32[3,128], index: 2, kind: output, shape index: {0}, may-alias: {0,2}]   ;;  %s101_s3 = inlined_call_operand.hbm [shape: f32[1,1], index: 3, kind: output, shape index: {1}]  }
   0x1   :  { %v14_v0 = vld [vmem:[%s99_s1] sm:$0x7] }
   0x2   :  { %v15_v1 = vld [vmem:[%s98_s0] sm:$0x7]  ;;  %v19_v3 = vsel %vm18_vm0, %v14_v0, 0.0 }
   0x3   :  { %v16_v2 = vadd.f32 %v15_v1, %v14_v0 }
   0x4   :  { %9 = vsyncpa [#allocation3], 0  ;;  %20 = vadd.xlane.f32.xlu0 %v19_v3  ;;  %s65_s18 = smov [#allocation2]   ;;  %vm22_vm1 = vcmask 0  }
   0x5   :  { %17 = vst [vmem:[%s100_s2] sm:$0x7] %v16_v2  ;;  %s32_s19 = sshll.u32 %s65_s18, 4  ;;  %s33_s19 = int_to_ptr.vmem [resolvable:$true] %s32_s19 }
   0x6   :  { %s43_s1 = scalar_lea.vmem %s33_s19, 16  ;;  %s47_s20 = scalar_lea.vmem %s33_s19, 32 }
   0x7   :  { %p44_p0 = scmp.ne.s32.totalorder %s33_s19, %s43_s1  ;;  %p48_p1 = scmp.lt.s32.totalorder %s33_s19, %s33_s19 }
   0x8   :  { %p49_p2 = scmp.lt.s32.totalorder %s47_s20, %s43_s1 }
   0xa   :  { %p50_p3 = por %p49_p2, %p48_p1 }
   0xc   :  { %p51_p4 = pnand %p50_p3, %p44_p0 }
  0x8d   :  { %v21_v4 = vpop.xlane.xlu0 %20 }
  0x8e   :  { %23 = vst.msk [vmem:[#allocation2] sm:$0x1] %vm22_vm1, %v21_v4 }
  0x8f   :  { %54 = shalt.err (!%p51_p4)
}
  0x90   :  { %35 = dma.vmem_to_hbm [thread:$0]  %s33_s19, 16, %s101_s3, [#allocation3]  }
  0x91   :  { %63 = dma.done.wait [#allocation3], 16  }
  0x92   :  { %64 = vsyncadd [#allocation3], 4294967280 }
  0x93   :  { %41 = vsyncpa [#allocation3], 1 }

</bundles_post_ra>
